<compile_context>
chip_gen: v5e
topology: v5e:2x2
jax: 0.10.0
libtpu: 0.0.40
codegen_flags: <defaults>
</compile_context>

<pallas_src>
import math

import jax
import jax.numpy as jnp
from jax.experimental import pallas as pl
from jax.experimental.pallas import tpu as pltpu


def _largest_divisor_leq(n, cap):
    for d in range(min(cap, n), 0, -1):
        if n % d == 0:
            return d
    return 1


# ---------------------------------------------------------------------------
# Kernel 1: M = max_s(Q·K_sample) - sum_s(Q·K_sample) / L_K   (per head)
#
# count_t[k, q] = #times key k was drawn for query row q (preserves the
# multiplicity of the torch.randint draw, so the sum term matches exactly).
# ---------------------------------------------------------------------------
def _m_scores(q, k, count_t, block_heads):
    BH, L_Q, D = q.shape
    _, L_K, _ = k.shape
    Bt = block_heads
    inv_lk = 1.0 / float(L_K)

    def kernel(q_ref, k_ref, cnt_ref, m_ref):
        cnt = cnt_ref[...]                      # (L_K, L_Q) f32, shared across heads
        member = cnt > 0.0
        for b in range(Bt):                     # static unroll over heads in the block
            kq = jax.lax.dot_general(           # K @ Q^T on the MXU -> (L_K, L_Q)
                k_ref[b], q_ref[b], (((1,), (1,)), ((), ())),
                preferred_element_type=jnp.float32)
            # reduce over sublanes -> result is already lane-dense (1, L_Q)
            s_sum = jnp.sum(kq * cnt, axis=0, keepdims=True)
            s_max = jnp.max(jnp.where(member, kq, -jnp.inf), axis=0, keepdims=True)
            m_ref[b] = s_max - s_sum * inv_lk

    out = pl.pallas_call(
        kernel,
        out_shape=jax.ShapeDtypeStruct((BH, 1, L_Q), jnp.float32),
        grid_spec=pltpu.PrefetchScalarGridSpec(
            num_scalar_prefetch=0,
            grid=(BH // Bt,),
            in_specs=[
                pl.BlockSpec((Bt, L_Q, D), lambda b: (b, 0, 0)),
                pl.BlockSpec((Bt, L_K, D), lambda b: (b, 0, 0)),
                pl.BlockSpec((L_K, L_Q), lambda b: (0, 0)),   # shared, fetched once
            ],
            out_specs=pl.BlockSpec((Bt, 1, L_Q), lambda b: (b, 0, 0)),
        ),
        compiler_params=pltpu.CompilerParams(
            dimension_semantics=("parallel",),
            vmem_limit_bytes=32 * 1024 * 1024),
    )(q, k, count_t)
    return out[:, 0, :]                          # (BH, L_Q)


# ---------------------------------------------------------------------------
# Kernel 2: sparse scores + ProbMask + softmax + attn@V + initial context +
#           one-hot-matmul scatter of updated rows (per head, heads batched).
# ---------------------------------------------------------------------------
def _sparse_attention_context(q_reduce, k, v, index, tril, scale, L_Q,
                              mask_flag, block_heads):
    BH, u, D = q_reduce.shape
    _, L_K, _ = k.shape
    Bt = block_heads
    out_dtype = v.dtype
    idx3 = index.astype(jnp.int32)[:, None, :]          # (BH, 1, u), lane-dense

    def kernel(*refs):
        if mask_flag:
            qr_ref, k_ref, v_ref, idx_ref, tril_ref, ctx_ref = refs
            tril_t = tril_ref[...]                       # (L_Q, L_K), shared
        else:
            qr_ref, k_ref, v_ref, idx_ref, ctx_ref = refs
            tril_t = None

        for b in range(Bt):                              # static unroll over heads
            qr = qr_ref[b]                               # (u, D)
            kk = k_ref[b]                                # (L_K, D)
            vv = v_ref[b]                                # (L_K, D)
            idx_row = idx_ref[b]                         # (1, u) int32

            # one-hot selection matrix: onehot[q, i] = (q == index[i])
            q_iota = jax.lax.broadcasted_iota(jnp.int32, (L_Q, u), 0)
            onehot = (q_iota == idx_row).astype(vv.dtype)             # (L_Q, u)

            # ---- initial context ------------------------------------------
            if mask_flag:
                # cumsum(V) along the sequence as a lower-triangular matmul (MXU)
                ctx0 = jnp.dot(tril_t, vv, preferred_element_type=jnp.float32)
            else:
                v_mean = jnp.sum(vv.astype(jnp.float32), axis=0,
                                 keepdims=True) * (1.0 / L_K)
                ctx0 = jnp.broadcast_to(v_mean, (L_Q, D))

            # ---- scores of the top-u queries (MXU) ------------------------
            scores = jax.lax.dot_general(
                qr, kk, (((1,), (1,)), ((), ())),
                preferred_element_type=jnp.float32) * scale           # (u, L_K)

            if mask_flag:
                # ProbMask: allowed[i, k] = (k <= index[i]) = (onehot^T @ tril)[i, k]
                allowed = jax.lax.dot_general(
                    onehot, tril_t, (((0,), (0,)), ((), ())),
                    preferred_element_type=jnp.float32)               # (u, L_K)
                scores = jnp.where(allowed > 0.5, scores, -jnp.inf)

            # ---- softmax (reciprocal on the EUP) + weighted sum (MXU) -----
            s_max = jnp.max(scores, axis=-1, keepdims=True)
            p = jnp.exp(scores - s_max)
            attn = p * pl.reciprocal(jnp.sum(p, axis=-1, keepdims=True), approx=True)
            upd = jnp.dot(attn.astype(vv.dtype), vv,
                          preferred_element_type=jnp.float32)         # (u, D) f32

            # ---- scatter via one-hot matmul + select (no per-row stores) --
            scattered = jnp.dot(onehot, upd.astype(vv.dtype),
                                preferred_element_type=jnp.float32)   # (L_Q, D)
            row_sel = jnp.sum(onehot, axis=-1, keepdims=True) > 0.5   # (L_Q, 1)
            ctx_ref[b] = jnp.where(row_sel, scattered, ctx0).astype(ctx_ref.dtype)

    in_specs = [
        pl.BlockSpec((Bt, u, D), lambda b: (b, 0, 0)),
        pl.BlockSpec((Bt, L_K, D), lambda b: (b, 0, 0)),
        pl.BlockSpec((Bt, L_K, D), lambda b: (b, 0, 0)),
        pl.BlockSpec((Bt, 1, u), lambda b: (b, 0, 0)),
    ]
    inputs = [q_reduce, k, v, idx3]
    if mask_flag:
        in_specs.append(pl.BlockSpec((L_Q, L_K), lambda b: (0, 0)))   # shared tril
        inputs.append(tril)

    ctx = pl.pallas_call(
        kernel,
        out_shape=jax.ShapeDtypeStruct((BH, L_Q, D), out_dtype),
        grid_spec=pltpu.PrefetchScalarGridSpec(
            num_scalar_prefetch=0,
            grid=(BH // Bt,),
            in_specs=in_specs,
            out_specs=pl.BlockSpec((Bt, L_Q, D), lambda b: (b, 0, 0)),
        ),
        compiler_params=pltpu.CompilerParams(
            dimension_semantics=("parallel",),
            vmem_limit_bytes=32 * 1024 * 1024),
    )(*inputs)
    return ctx


# ---------------------------------------------------------------------------
# Full forward (mirrors ProbAttention.forward; dropout is defined but never
# applied in the reference forward; output_attention=False)
# ---------------------------------------------------------------------------
def prob_attention_forward(queries, keys, values, attn_mask=None, *,
                           sample_key, factor=5, scale=None, mask_flag=True,
                           block_heads=None):
    del attn_mask  # ProbMask is built internally, like the PyTorch module
    B, L_Q, H, D = queries.shape
    _, L_K, _, _ = keys.shape
    BH = B * H

    q = jnp.transpose(queries, (0, 2, 1, 3)).reshape(BH, L_Q, D)
    k = jnp.transpose(keys, (0, 2, 1, 3)).reshape(BH, L_K, D)
    v = jnp.transpose(values, (0, 2, 1, 3)).reshape(BH, L_K, D)

    U_part = min(factor * int(math.ceil(math.log(L_K))), L_K)
    u = min(factor * int(math.ceil(math.log(L_Q))), L_Q)
    if mask_flag:
        assert L_Q == L_K

    if block_heads is None:
        # cap heads per grid step (keeps the per-step block well inside v7x's VMEM
        # and leaves enough grid steps for megacore sharding / pipelining)
        block_heads = _largest_divisor_leq(BH, 4)
    assert BH % block_heads == 0

    # torch.randint-equivalent sampling, folded into a multiplicity-preserving
    # count matrix count_t[k, q] = #times key k was drawn for query row q.
    index_sample = jax.random.randint(sample_key, (L_Q, U_part), 0, L_K)
    count_t = jnp.zeros((L_K, L_Q), jnp.float32).at[
        index_sample, jnp.arange(L_Q)[:, None]].add(1.0)

    M = _m_scores(q, k, count_t, block_heads)                    # (BH, L_Q) f32
    _, m_top = jax.lax.top_k(M, u)                               # (BH, u)
    q_reduce = jnp.take_along_axis(q, m_top[:, :, None], axis=1)  # (BH, u, D)

    scale_val = scale if scale is not None else 1.0 / math.sqrt(D)

    tril = None
    if mask_flag:
        tril = (jnp.arange(L_K)[None, :] <= jnp.arange(L_Q)[:, None]).astype(v.dtype)

    context = _sparse_attention_context(q_reduce, k, v, m_top, tril, scale_val,
                                        L_Q, mask_flag, block_heads)

    # TODO(synk): output_attention=True path (full L_V x L_V attention map) not implemented;
    # attention_dropout is defined in the module but never applied in its forward.
    return context.reshape(B, H, L_Q, D), None


# ---------------------------------------------------------------------------
# Pure-JAX reference (same sampling key -> same index_sample)
# ---------------------------------------------------------------------------
def prob_attention_reference(queries, keys, values, sample_key, factor=5,
                             scale=None, mask_flag=True):
    B, L_Q, H, D = queries.shape
    _, L_K, _, _ = keys.shape
    q = jnp.transpose(queries, (0, 2, 1, 3))
    k = jnp.transpose(keys, (0, 2, 1, 3))
    v = jnp.transpose(values, (0, 2, 1, 3))
    U_part = min(factor * int(math.ceil(math.log(L_K))), L_K)
    u = min(factor * int(math.ceil(math.log(L_Q))), L_Q)
    index_sample = jax.random.randint(sample_key, (L_Q, U_part), 0, L_K)
    K_sample = k[:, :, index_sample, :]
    QKs = jnp.einsum('bhqd,bhqsd->bhqs', q, K_sample)
    M = QKs.max(-1) - QKs.sum(-1) / L_K
    _, M_top = jax.lax.top_k(M, u)
    Q_reduce = jnp.take_along_axis(q, M_top[..., None], axis=2)
    sc = scale if scale is not None else 1.0 / math.sqrt(D)
    scores = jnp.einsum('bhud,bhkd->bhuk', Q_reduce, k) * sc
    if mask_flag:
        context = jnp.cumsum(v, axis=2)
        mask = jnp.arange(L_K)[None, None, None, :] > M_top[..., None]
        scores = jnp.where(mask, -jnp.inf, scores)
    else:
        context = jnp.broadcast_to(v.mean(axis=2, keepdims=True), (B, H, L_Q, D))
    attn = jax.nn.softmax(scores, axis=-1)
    upd = jnp.einsum('bhuk,bhkd->bhud', attn, v)
    bi = jnp.arange(B)[:, None, None]
    hi = jnp.arange(H)[None, :, None]
    return context.at[bi, hi, M_top].set(upd)


if __name__ == "__main__":
    key = jax.random.PRNGKey(0)
    kq, kk_, kv, ksamp = jax.random.split(key, 4)
    B, L, H, D = 2, 16, 4, 32      # queries/keys/values: (B, L, H, D)

    queries = jax.random.normal(kq, (B, L, H, D), jnp.float32)
    keys = jax.random.normal(kk_, (B, L, H, D), jnp.float32)
    values = jax.random.normal(kv, (B, L, H, D), jnp.float32)

    # masked (self-attention) path
    context, attn = prob_attention_forward(queries, keys, values, None,
                                           sample_key=ksamp, mask_flag=True)
    context = jax.block_until_ready(context)
    assert context.shape == (B, H, L, D)
    assert attn is None
    ref = prob_attention_reference(queries, keys, values, ksamp, mask_flag=True)
    assert jnp.allclose(context, ref, atol=5e-3, rtol=5e-3), "masked mismatch vs reference"

    # unmasked (cross-attention) path
    context2, _ = prob_attention_forward(queries, keys, values, None,
                                         sample_key=ksamp, mask_flag=False)
    context2 = jax.block_until_ready(context2)
    ref2 = prob_attention_reference(queries, keys, values, ksamp, mask_flag=False)
    assert jnp.allclose(context2, ref2, atol=5e-3, rtol=5e-3), "unmasked mismatch vs reference"

    print("KERNEL_OK")
</pallas_src>

<mosaic_0001>
module attributes {stable_mosaic.version = 11 : i64} {
  func.func @kernel(%arg0: i32, %arg1: memref<4x16x32xf32, #tpu.memory_space<vmem>>, %arg2: memref<4x16x32xf32, #tpu.memory_space<vmem>>, %arg3: memref<16x16xf32, #tpu.memory_space<vmem>>, %arg4: memref<4x1x16xf32, #tpu.memory_space<vmem>>) attributes {dimension_semantics = [#tpu.dimension_semantics<parallel>], iteration_bounds = array<i64: 2>, scalar_prefetch = 0 : i64, scratch_operands = 0 : i64, tpu.core_type = #tpu.core_type<tc>, window_params = [{transform_indices = @transform_0, window_bounds = array<i64: 4, 16, 32>}, {transform_indices = @transform_1, window_bounds = array<i64: 4, 16, 32>}, {pipeline_mode = #tpu.pipeline_mode<synchronous>, transform_indices = @transform_2, window_bounds = array<i64: 16, 16>}, {transform_indices = @transform_3, window_bounds = array<i64: 4, 1, 16>}]} {
    %c0 = arith.constant 0 : index
    %c0_0 = arith.constant 0 : index
    %0 = vector.load %arg3[%c0, %c0_0] : memref<16x16xf32, #tpu.memory_space<vmem>>, vector<16x16xf32>
    %cst = arith.constant 0.000000e+00 : f32
    %1 = vector.broadcast %cst : f32 to vector<16x16xf32>
    %2 = arith.cmpf ogt, %0, %1 : vector<16x16xf32>
    %c0_1 = arith.constant 0 : index
    %c0_2 = arith.constant 0 : index
    %c0_3 = arith.constant 0 : index
    %3 = vector.load %arg2[%c0_1, %c0_2, %c0_3] : memref<4x16x32xf32, #tpu.memory_space<vmem>>, vector<1x16x32xf32>
    %4 = vector.shape_cast %3 : vector<1x16x32xf32> to vector<16x32xf32>
    %c0_4 = arith.constant 0 : index
    %c0_5 = arith.constant 0 : index
    %c0_6 = arith.constant 0 : index
    %5 = vector.load %arg1[%c0_4, %c0_5, %c0_6] : memref<4x16x32xf32, #tpu.memory_space<vmem>>, vector<1x16x32xf32>
    %6 = vector.shape_cast %5 : vector<1x16x32xf32> to vector<16x32xf32>
    %cst_7 = arith.constant dense<0.000000e+00> : vector<16x16xf32>
    %7 = tpu.matmul %4, %6, %cst_7 {dimension_numbers = #tpu.dot_dimension_numbers<[1], [1], [0], [0], [0, 0, 1, 0], [], []>} : vector<16x32xf32>, vector<16x32xf32>, vector<16x16xf32> -> vector<16x16xf32>
    %8 = arith.mulf %7, %0 : vector<16x16xf32>
    %cst_8 = arith.constant dense<0.000000e+00> : vector<16xf32>
    %9 = vector.multi_reduction <add>, %8, %cst_8 [0] : vector<16x16xf32> to vector<16xf32>
    %10 = vector.shape_cast %9 : vector<16xf32> to vector<1x16xf32>
    %cst_9 = arith.constant 0xFF800000 : f32
    %11 = vector.broadcast %cst_9 : f32 to vector<16x16xf32>
    %12 = arith.select %2, %7, %11 : vector<16x16xi1>, vector<16x16xf32>
    %cst_10 = arith.constant dense<0xFF800000> : vector<16xf32>
    %13 = vector.multi_reduction <maximumf>, %12, %cst_10 [0] : vector<16x16xf32> to vector<16xf32>
    %14 = vector.shape_cast %13 : vector<16xf32> to vector<1x16xf32>
    %cst_11 = arith.constant 6.250000e-02 : f32
    %15 = vector.broadcast %cst_11 : f32 to vector<1x16xf32>
    %16 = arith.mulf %10, %15 : vector<1x16xf32>
    %17 = arith.subf %14, %16 : vector<1x16xf32>
    %c0_12 = arith.constant 0 : index
    %c0_13 = arith.constant 0 : index
    %c0_14 = arith.constant 0 : index
    %18 = vector.load %arg4[%c0_12, %c0_13, %c0_14] : memref<4x1x16xf32, #tpu.memory_space<vmem>>, vector<1x1x16xf32>
    %19 = vector.shape_cast %18 : vector<1x1x16xf32> to vector<1x16xf32>
    %20 = vector.shape_cast %17 : vector<1x16xf32> to vector<1x1x16xf32>
    tpu.vector_store %arg4[%c0_12, %c0_13, %c0_14], %20 {strides = array<i32>} : memref<4x1x16xf32, #tpu.memory_space<vmem>>, vector<1x1x16xf32>,
    %c1 = arith.constant 1 : index
    %c0_15 = arith.constant 0 : index
    %c0_16 = arith.constant 0 : index
    %21 = vector.load %arg2[%c1, %c0_15, %c0_16] : memref<4x16x32xf32, #tpu.memory_space<vmem>>, vector<1x16x32xf32>
    %22 = vector.shape_cast %21 : vector<1x16x32xf32> to vector<16x32xf32>
    %c1_17 = arith.constant 1 : index
    %c0_18 = arith.constant 0 : index
    %c0_19 = arith.constant 0 : index
    %23 = vector.load %arg1[%c1_17, %c0_18, %c0_19] : memref<4x16x32xf32, #tpu.memory_space<vmem>>, vector<1x16x32xf32>
    %24 = vector.shape_cast %23 : vector<1x16x32xf32> to vector<16x32xf32>
    %cst_20 = arith.constant dense<0.000000e+00> : vector<16x16xf32>
    %25 = tpu.matmul %22, %24, %cst_20 {dimension_numbers = #tpu.dot_dimension_numbers<[1], [1], [0], [0], [0, 0, 1, 0], [], []>} : vector<16x32xf32>, vector<16x32xf32>, vector<16x16xf32> -> vector<16x16xf32>
    %26 = arith.mulf %25, %0 : vector<16x16xf32>
    %cst_21 = arith.constant dense<0.000000e+00> : vector<16xf32>
    %27 = vector.multi_reduction <add>, %26, %cst_21 [0] : vector<16x16xf32> to vector<16xf32>
    %28 = vector.shape_cast %27 : vector<16xf32> to vector<1x16xf32>
    %cst_22 = arith.constant 0xFF800000 : f32
    %29 = vector.broadcast %cst_22 : f32 to vector<16x16xf32>
    %30 = arith.select %2, %25, %29 : vector<16x16xi1>, vector<16x16xf32>
    %cst_23 = arith.constant dense<0xFF800000> : vector<16xf32>
    %31 = vector.multi_reduction <maximumf>, %30, %cst_23 [0] : vector<16x16xf32> to vector<16xf32>
    %32 = vector.shape_cast %31 : vector<16xf32> to vector<1x16xf32>
    %cst_24 = arith.constant 6.250000e-02 : f32
    %33 = vector.broadcast %cst_24 : f32 to vector<1x16xf32>
    %34 = arith.mulf %28, %33 : vector<1x16xf32>
    %35 = arith.subf %32, %34 : vector<1x16xf32>
    %c1_25 = arith.constant 1 : index
    %c0_26 = arith.constant 0 : index
    %c0_27 = arith.constant 0 : index
    %36 = vector.load %arg4[%c1_25, %c0_26, %c0_27] : memref<4x1x16xf32, #tpu.memory_space<vmem>>, vector<1x1x16xf32>
    %37 = vector.shape_cast %36 : vector<1x1x16xf32> to vector<1x16xf32>
    %38 = vector.shape_cast %35 : vector<1x16xf32> to vector<1x1x16xf32>
    tpu.vector_store %arg4[%c1_25, %c0_26, %c0_27], %38 {strides = array<i32>} : memref<4x1x16xf32, #tpu.memory_space<vmem>>, vector<1x1x16xf32>,
    %c2 = arith.constant 2 : index
    %c0_28 = arith.constant 0 : index
    %c0_29 = arith.constant 0 : index
    %39 = vector.load %arg2[%c2, %c0_28, %c0_29] : memref<4x16x32xf32, #tpu.memory_space<vmem>>, vector<1x16x32xf32>
    %40 = vector.shape_cast %39 : vector<1x16x32xf32> to vector<16x32xf32>
    %c2_30 = arith.constant 2 : index
    %c0_31 = arith.constant 0 : index
    %c0_32 = arith.constant 0 : index
    %41 = vector.load %arg1[%c2_30, %c0_31, %c0_32] : memref<4x16x32xf32, #tpu.memory_space<vmem>>, vector<1x16x32xf32>
    %42 = vector.shape_cast %41 : vector<1x16x32xf32> to vector<16x32xf32>
    %cst_33 = arith.constant dense<0.000000e+00> : vector<16x16xf32>
    %43 = tpu.matmul %40, %42, %cst_33 {dimension_numbers = #tpu.dot_dimension_numbers<[1], [1], [0], [0], [0, 0, 1, 0], [], []>} : vector<16x32xf32>, vector<16x32xf32>, vector<16x16xf32> -> vector<16x16xf32>
    %44 = arith.mulf %43, %0 : vector<16x16xf32>
    %cst_34 = arith.constant dense<0.000000e+00> : vector<16xf32>
    %45 = vector.multi_reduction <add>, %44, %cst_34 [0] : vector<16x16xf32> to vector<16xf32>
    %46 = vector.shape_cast %45 : vector<16xf32> to vector<1x16xf32>
    %cst_35 = arith.constant 0xFF800000 : f32
    %47 = vector.broadcast %cst_35 : f32 to vector<16x16xf32>
    %48 = arith.select %2, %43, %47 : vector<16x16xi1>, vector<16x16xf32>
    %cst_36 = arith.constant dense<0xFF800000> : vector<16xf32>
    %49 = vector.multi_reduction <maximumf>, %48, %cst_36 [0] : vector<16x16xf32> to vector<16xf32>
    %50 = vector.shape_cast %49 : vector<16xf32> to vector<1x16xf32>
    %cst_37 = arith.constant 6.250000e-02 : f32
    %51 = vector.broadcast %cst_37 : f32 to vector<1x16xf32>
    %52 = arith.mulf %46, %51 : vector<1x16xf32>
    %53 = arith.subf %50, %52 : vector<1x16xf32>
    %c2_38 = arith.constant 2 : index
    %c0_39 = arith.constant 0 : index
    %c0_40 = arith.constant 0 : index
    %54 = vector.load %arg4[%c2_38, %c0_39, %c0_40] : memref<4x1x16xf32, #tpu.memory_space<vmem>>, vector<1x1x16xf32>
    %55 = vector.shape_cast %54 : vector<1x1x16xf32> to vector<1x16xf32>
    %56 = vector.shape_cast %53 : vector<1x16xf32> to vector<1x1x16xf32>
    tpu.vector_store %arg4[%c2_38, %c0_39, %c0_40], %56 {strides = array<i32>} : memref<4x1x16xf32, #tpu.memory_space<vmem>>, vector<1x1x16xf32>,
    %c3 = arith.constant 3 : index
    %c0_41 = arith.constant 0 : index
    %c0_42 = arith.constant 0 : index
    %57 = vector.load %arg2[%c3, %c0_41, %c0_42] : memref<4x16x32xf32, #tpu.memory_space<vmem>>, vector<1x16x32xf32>
    %58 = vector.shape_cast %57 : vector<1x16x32xf32> to vector<16x32xf32>
    %c3_43 = arith.constant 3 : index
    %c0_44 = arith.constant 0 : index
    %c0_45 = arith.constant 0 : index
    %59 = vector.load %arg1[%c3_43, %c0_44, %c0_45] : memref<4x16x32xf32, #tpu.memory_space<vmem>>, vector<1x16x32xf32>
    %60 = vector.shape_cast %59 : vector<1x16x32xf32> to vector<16x32xf32>
    %cst_46 = arith.constant dense<0.000000e+00> : vector<16x16xf32>
    %61 = tpu.matmul %58, %60, %cst_46 {dimension_numbers = #tpu.dot_dimension_numbers<[1], [1], [0], [0], [0, 0, 1, 0], [], []>} : vector<16x32xf32>, vector<16x32xf32>, vector<16x16xf32> -> vector<16x16xf32>
    %62 = arith.mulf %61, %0 : vector<16x16xf32>
    %cst_47 = arith.constant dense<0.000000e+00> : vector<16xf32>
    %63 = vector.multi_reduction <add>, %62, %cst_47 [0] : vector<16x16xf32> to vector<16xf32>
    %64 = vector.shape_cast %63 : vector<16xf32> to vector<1x16xf32>
    %cst_48 = arith.constant 0xFF800000 : f32
    %65 = vector.broadcast %cst_48 : f32 to vector<16x16xf32>
    %66 = arith.select %2, %61, %65 : vector<16x16xi1>, vector<16x16xf32>
    %cst_49 = arith.constant dense<0xFF800000> : vector<16xf32>
    %67 = vector.multi_reduction <maximumf>, %66, %cst_49 [0] : vector<16x16xf32> to vector<16xf32>
    %68 = vector.shape_cast %67 : vector<16xf32> to vector<1x16xf32>
    %cst_50 = arith.constant 6.250000e-02 : f32
    %69 = vector.broadcast %cst_50 : f32 to vector<1x16xf32>
    %70 = arith.mulf %64, %69 : vector<1x16xf32>
    %71 = arith.subf %68, %70 : vector<1x16xf32>
    %c3_51 = arith.constant 3 : index
    %c0_52 = arith.constant 0 : index
    %c0_53 = arith.constant 0 : index
    %72 = vector.load %arg4[%c3_51, %c0_52, %c0_53] : memref<4x1x16xf32, #tpu.memory_space<vmem>>, vector<1x1x16xf32>
    %73 = vector.shape_cast %72 : vector<1x1x16xf32> to vector<1x16xf32>
    %74 = vector.shape_cast %71 : vector<1x16xf32> to vector<1x1x16xf32>
    tpu.vector_store %arg4[%c3_51, %c0_52, %c0_53], %74 {strides = array<i32>} : memref<4x1x16xf32, #tpu.memory_space<vmem>>, vector<1x1x16xf32>,
    return
  }
  func.func @transform_0(%arg0: i32) -> (i32, i32, i32) {
    %c0_i32 = arith.constant 0 : i32
    %c0_i32_0 = arith.constant 0 : i32
    %c0_i32_1 = arith.constant 0 : i32
    return %arg0, %c0_i32, %c0_i32_0 : i32, i32, i32
  }
  func.func @transform_1(%arg0: i32) -> (i32, i32, i32) {
    %c0_i32 = arith.constant 0 : i32
    %c0_i32_0 = arith.constant 0 : i32
    %c0_i32_1 = arith.constant 0 : i32
    return %arg0, %c0_i32, %c0_i32_0 : i32, i32, i32
  }
  func.func @transform_2(%arg0: i32) -> (i32, i32) {
    %c0_i32 = arith.constant 0 : i32
    %c0_i32_0 = arith.constant 0 : i32
    %c0_i32_1 = arith.constant 0 : i32
    return %c0_i32, %c0_i32_0 : i32, i32
  }
  func.func @transform_3(%arg0: i32) -> (i32, i32, i32) {
    %c0_i32 = arith.constant 0 : i32
    %c0_i32_0 = arith.constant 0 : i32
    %c0_i32_1 = arith.constant 0 : i32
    return %arg0, %c0_i32, %c0_i32_0 : i32, i32, i32
  }
}

</mosaic_0001>

<bundles_post_ra>
// kernel: tpu_custom_call.1
= control target key start
LH: loop header
LB: loop body
LE: loop exit
PB: predicated region body
PF: predicated region fallthrough
CT: control target
= control target key end

     0   :  { %s1189_s0 = inlined_call_operand.hbm [shape: f32[8,16,32], index: 0, kind: input, shape index: {}]   ;;  %s1190_s1 = inlined_call_operand.hbm [shape: f32[8,16,32], index: 1, kind: input, shape index: {}]   ;;  %s1191_s2 = inlined_call_operand.hbm [shape: f32[16,16], index: 2, kind: input, shape index: {}]   ;;  %s1192_s3 = inlined_call_operand.hbm [shape: f32[8,1,16], index: 3, kind: output, shape index: {}]  }
   0x1   :  { %1197 = sst [smem:[#allocation13_spill]] %s1189_s0 }
   0x2   :  { %8 = vsyncpa [#allocation3], 0 }
   0x3   :  { %10 = vsyncpa [#allocation3 + $0x1], 0 }
   0x4   :  { %11 = vsyncpa [#allocation6], 0 }
   0x5   :  { %13 = vsyncpa [#allocation6 + $0x1], 0 }
   0x6   :  { %14 = vsyncpa [#allocation4], 0 }
   0x7   :  { %16 = vsyncpa [#allocation4 + $0x1], 0  ;;  %s959_s12 = smov 0   ;;  %s961_s13 = smov 0  }
   0x8   :  { %s963_s14 = smov 0   ;;  %s965_s15 = smov 0  }
   0x9 LB: > { %s980_s16 = sadd.s32 4294967295, %s932_s15   ;;  %s646_s17 = sadd.s32 4294967294, %s932_s15   ;;  %s932_s15 = sphi %s965_s15, %s1210_s15   ;;  %s928_s14 = sphi %s963_s14, %s1209_s14   ;;  %s924_s13 = sphi %s961_s13, %s1208_s13   ;;  %s920_s12 = sphi %s959_s12, %s1207_s12  }
   0xa   : > { %p42_p0 = scmp.ne.s32.totalorder %s924_s13, %s920_s12  ;;  %p43_p1 = scmp.eq.s32.totalorder %s980_s16, 0 }
   0xb   : > { %p113_p2 = scmp.eq.s32.totalorder %s980_s16, 1  ;;  %p119_p3 = scmp.eq.s32.totalorder %s646_s17, 1 }
   0xc   : > { %p989_p4 = por %p43_p1, %p42_p0  ;;  %p647_p5 = scmp.ge.s32.totalorder %s932_s15, 1 }
   0xd   : > { %p994_p6 = por %p119_p3, %p42_p0  ;;  %p126_p7 = scmp.lt.s32.totalorder %s932_s15, 3 }
   0xe   : > { %s137_s22 = sshll.u32 %s1191_s2, 4  ;;  %s934_s24 = smov [#allocation7]   ;;  %s138_s22 = int_to_ptr.hbm [resolvable:$true] %s137_s22 }
   0xf   : > { %p1002_p8 = pnand %p647_p5, %p126_p7  ;;  %s139_s25 = sshll.u32 %s934_s24, 4  ;;  %s140_s25 = int_to_ptr.vmem [resolvable:$true] %s139_s25 }
  0x10   : > { %s1012_s26 = sadd.s32 1, %s932_s15   ;;  %s1193_s27 = smov 128  }
  0x11   : > { %p712_p9 = pneg %p1002_p8  ;;  %s1195_s28 = smov 8  }
  0x12   : > { %s26_s29 = ssub.s32 %s932_s15, %s1012_s26  ;;  %s29_s30 = sadd.s32 1, %s928_s14 }
  0x13   : > { %p713_p10 = pnand %p712_p9, %p43_p1  ;;  %p27_p12 = scmp.eq.s32.totalorder %s26_s29, 0 }
  0x14   : > { %p36_p13 = scmp.ne.s32.totalorder %s928_s14, %s924_s13  ;;  %p37_p0 = scmp.eq.s32.totalorder %s932_s15, 0 }
  0x15   : > { %715 = dma.hbm_to_vmem [thread:$0]  (!%p713_p10), %s138_s22, 256, %s140_s25, [#allocation6], %s1193_s27, %s1193_s27, %s1195_s28  }
  0x16   : > { %p728_p3 = scmp.lt.s32.totalorder %s932_s15, 2  ;;  %p38_p5 = por %p37_p0, %p36_p13 }
  0x17   : > { %s1025_s4 = scalar_select %p27_p12, %s928_s14, %s29_s30  }
  0x18   : > { %p1029_p7 = por %p113_p2, %p36_p13  ;;  %s153_s6 = sand.u32 1, %s928_s14  }
  0x19   : > { %s699_s7 = sshll.u32 %s932_s15, 6  ;;  %s650_s8 = sshll.u32 %s153_s6, 6 }
  0x1a   : > { %s1202_s0 = sld [smem:[#allocation13_spill]]  ;;  %s157_s20 = scalar_lea.vmem [#allocation2], %s650_s8 }
  0x1b   : > { %s166_s21 = sshll.u32 %s157_s20, 4  ;;  %p1040_p9 = pnand %p728_p3, %p38_p5  ;;  %s167_s21 = int_to_ptr.vmem [resolvable:$true] %s166_s21 }
  0x1c   : > { %s186_s29 = scalar_lea.hbm %s1190_s1, %s699_s7  ;;  %s180_s30 = scalar_lea.vmem [#allocation5], %s650_s8 }
  0x1d   : > { %s1047_s27 = sshll.u32 %s180_s30, 4  ;;  %s187_s9 = sshll.u32 %s186_s29, 4  ;;  %s188_s9 = int_to_ptr.hbm [resolvable:$true] %s187_s9  ;;  %s190_s27 = int_to_ptr.vmem [resolvable:$true] %s1047_s27 }
  0x1e   : > { %s154_s10 = scalar_lea.sflag [#allocation3], %s153_s6  ;;  %p802_p10 = pneg %p1040_p9 }
  0x20   : > { %s163_s11 = scalar_lea.hbm %s1202_s0, %s699_s7  ;;  %s805_s25 = scalar_lea.hbm %s1202_s0, 128 }
  0x21   : > { %s164_s17 = sshll.u32 %s163_s11, 4  ;;  %s165_s17 = int_to_ptr.hbm [resolvable:$true] %s164_s17 }
  0x22   : > { %s798_s11 = sshra.s32 %s165_s17, 4  ;;  %s799_s11 = int_to_ptr.hbm [resolvable:$true] %s798_s11 }
  0x23   : > { %s800_s20 = scalar_lea.hbm %s799_s11, 64  ;;  %p806_p0 = scmp.lt.s32.totalorder %s799_s11, %s1202_s0 }
  0x24   : > { %p801_p2 = scmp.ne.s32.totalorder %s799_s11, %s800_s20  ;;  %p807_p3 = scmp.lt.s32.totalorder %s805_s25, %s800_s20 }
  0x26   : > { %p803_p12 = pnand %p802_p10, %p801_p2  ;;  %p808_p5 = por %p807_p3, %p806_p0 }
  0x28   : > { %p804_p13 = pneg %p803_p12 }
  0x2a   : > { %p809_p11 = pnand %p808_p5, %p804_p13 }
  0x2c   : > { %812 = shalt.err (!%p809_p11)
}
  0x2d   : > { %s1204_s6 = smov 8   ;;  %s1205_s29 = smov 128  }
  0x2e   : > { %719 = dma.hbm_to_vmem [thread:$0]  (!%p1040_p9), %s165_s17, 1024, %s167_s21, %s154_s10, %s1205_s29, %s1205_s29, %s1204_s6  }
  0x2f   : > { %s176_s28 = sand.u32 1, %s932_s15   ;;  %s828_s24 = sshra.s32 %s188_s9, 4  ;;  %s829_s24 = int_to_ptr.hbm [resolvable:$true] %s828_s24 }
  0x30   : > { %s177_s30 = scalar_lea.sflag [#allocation6], %s176_s28  ;;  %s830_s11 = scalar_lea.hbm %s829_s24, 64 }
  0x31   : > { %p831_p2 = scmp.ne.s32.totalorder %s829_s24, %s830_s11  ;;  %s835_s7 = scalar_lea.hbm %s1190_s1, 128 }
  0x32   : > { %p836_p13 = scmp.lt.s32.totalorder %s829_s24, %s1190_s1  ;;  %p837_p0 = scmp.lt.s32.totalorder %s835_s7, %s830_s11 }
  0x33   : > { %p833_p11 = pnand %p831_p2, %p802_p10 }
  0x34   : > { %p838_p3 = por %p837_p0, %p836_p13 }
  0x35   : > { %p834_p12 = pneg %p833_p11 }
  0x37   : > { %p839_p5 = pnand %p838_p3, %p834_p12 }
  0x39   : > { %842 = shalt.err (!%p839_p5)
}
  0x3a   : > { %722 = dma.hbm_to_vmem [thread:$0]  (!%p1040_p9), %s188_s9, 1024, %s190_s27, %s177_s30, %s1205_s29, %s1205_s29, %s1204_s6  }
  0x3b   : > { %201 = sbr.rel (%p1002_p8) target bundleno = 246 (0xf6), region = 32  ;;  %s1084_s17 = sand.u32 (!%p1002_p8), 1, %s924_s13  }
  0x3c   : > { %s659_s0 = sshll.u32 (!%p1002_p8), %s1084_s17, 6  ;;  %s204_s21 = scalar_lea.sflag (!%p1002_p8), [#allocation3], %s1084_s17 }
  0x3d   : > { %s207_s10 = scalar_lea.vmem (!%p1002_p8), [#allocation2], %s659_s0 }
  0x40   : > { %903 = dma.done.wait (%p989_p4), %s204_s21, 1024  }
  0x41   : > { %905 = vsyncadd (%p989_p4), %s204_s21, 4294966272  ;;  %s213_s27 = sand.u32 1, %s980_s16   ;;  %s1093_s23 = scalar_lea.vmem [#allocation5], %s659_s0 }
  0x42   : > { %s214_s22 = scalar_lea.sflag [#allocation6], %s213_s27 }
  0x43   : > { %907 = dma.done.wait (%p989_p4), %s214_s22, 1024  }
  0x44   : > { %909 = vsyncadd (%p989_p4), %s214_s22, 4294966272 }
  0x45   : > { %911 = dma.done.wait (%p43_p1), [#allocation6], 256  }
  0x46   : > { %913 = vsyncadd (%p43_p1), [#allocation6], 4294967040  ;;  %vm262_vm0 = vcmask 261120   ;;  %v261_v0 = vld [vmem:[%s207_s10 + $0x8] sm:$0xff]  ;;  %v670_v1 = vld [vmem:[%s207_s10 + $0x18] sm:$0xff]  ;;  %vm300_vm2 = vcmask 130048  }
  0x47   : > { %v679_v2 = vld [vmem:[%s207_s10 + $0x28] sm:$0xff]  ;;  %663 = vmatpush.xpose.msk.msra.mxu0 %vm262_vm0, %v261_v0  ;;  %671 = vmatpush.xpose.msk.msra.mxu1 %vm262_vm0, %v670_v1  ;;  %v688_v3 = vld [vmem:[%s207_s10 + $0x38] sm:$0xff]  ;;  %v260_v4 = vld [vmem:[%s207_s10] sm:$0xff]  ;;  %s662_s18 = sshll.u32 %s1084_s17, 2  ;;  %vm323_vm4 = vcmask 122880   ;;  %s695_s9 = sshll.u32 %s980_s16, 2 }
  0x48   : > { %680 = vmatpush.xpose.msk.msra.mxu2 %vm262_vm0, %v679_v2  ;;  %689 = vmatpush.xpose.msk.msra.mxu3 %vm262_vm0, %v688_v3  ;;  %v669_v5 = vld [vmem:[%s207_s10 + $0x10] sm:$0xff]  ;;  %v678_v6 = vld [vmem:[%s207_s10 + $0x20] sm:$0xff]  ;;  %v259_v12 = vld [vmem:[%s1093_s23 + $0x8] sm:$0xff]  ;;  %s250_s6 = scalar_lea.vmem [#allocation8], %s662_s18  ;;  %s537_s30 = scalar_lea.hbm %s1192_s3, %s695_s9 }
  0x49   : > { %v687_v7 = vld [vmem:[%s207_s10 + $0x30] sm:$0xff]  ;;  %v258_v8 = vld [vmem:[%s1093_s23] sm:$0xff]  ;;  %v668_v13 = vld [vmem:[%s1093_s23 + $0x18] sm:$0xff]  ;;  %s538_s16 = sshll.u32 %s250_s6, 4  ;;  %s540_s24 = sshll.u32 %s537_s30, 4  ;;  %s539_s16 = int_to_ptr.vmem [resolvable:$true] %s538_s16  ;;  %s541_s24 = int_to_ptr.hbm [resolvable:$true] %s540_s24 }
  0x4a   : > { %v667_v9 = vld [vmem:[%s1093_s23 + $0x10] sm:$0xff]  ;;  %v676_v10 = vld [vmem:[%s1093_s23 + $0x20] sm:$0xff]  ;;  %v677_v14 = vld [vmem:[%s1093_s23 + $0x28] sm:$0xff]  ;;  %s527_s11 = scalar_lea.sflag [#allocation4], %s1084_s17  ;;  %s872_s20 = sshra.s32 %s541_s24, 4  ;;  %s873_s20 = int_to_ptr.hbm [resolvable:$true] %s872_s20 }
  0x4b   : > { %664 = vmatpush.xpose.msk.msra.mxu0 %vm262_vm0, %v260_v4  ;;  %672 = vmatpush.xpose.msk.msra.mxu1 %vm262_vm0, %v669_v5  ;;  %v685_v11 = vld [vmem:[%s1093_s23 + $0x30] sm:$0xff]  ;;  %v686_v15 = vld [vmem:[%s1093_s23 + $0x38] sm:$0xff]  ;;  %v254_v16 = vld [vmem:[#allocation7] sm:$0xff]  ;;  %s874_s25 = scalar_lea.hbm %s873_s20, 4  ;;  %s878_s0 = scalar_lea.hbm %s1192_s3, 8 }
  0x4c   : > { %681 = vmatpush.xpose.msk.msra.mxu2 %vm262_vm0, %v678_v6  ;;  %690 = vmatpush.xpose.msk.msra.mxu3 %vm262_vm0, %v687_v7  ;;  %vm256_vm1 = vcmp.gt.f32.partialorder %v254_v16, 0.0  ;;  %v255_v19 = vld [vmem:[#allocation7 + $0x8] sm:$0xff]  ;;  %p875_p1 = scmp.ne.s32.totalorder %s873_s20, %s874_s25  ;;  %p879_p9 = scmp.lt.s32.totalorder %s873_s20, %s1192_s3 }
  0x4d   : > { %vm257_vm3 = vcmp.gt.f32.partialorder %v255_v19, 0.0  ;;  %p880_p10 = scmp.lt.s32.totalorder %s878_s0, %s874_s25 }
  0x4e   : > { %665 = vmatmul.msk.f32.vlgmr.msra.gmra.mxu0 %vm262_vm0, %v258_v8  ;;  %673 = vmatmul.msk.f32.vlgmr.msra.gmra.mxu1 %vm262_vm0, %v667_v9  ;;  %p876_p4 = pnand %p875_p1, %p1029_p7 }
  0x4f   : > { %682 = vmatmul.msk.f32.vlgmr.msra.gmra.mxu2 %vm262_vm0, %v676_v10  ;;  %691 = vmatmul.msk.f32.vlgmr.msra.gmra.mxu3 %vm262_vm0, %v685_v11  ;;  %p881_p2 = por %p880_p10, %p879_p9 }
  0x50   : > { %p877_p8 = pneg %p876_p4 }
  0x52   : > { %p882_p11 = pnand %p881_p2, %p877_p8 }
  0x56   : > { %666 = vmatmul.msk.f32.gmra.mxu0 %vm262_vm0, %v259_v12  ;;  %674 = vmatmul.msk.f32.gmra.mxu1 %vm262_vm0, %v668_v13 }
  0x57   : > { %683 = vmatmul.msk.f32.gmra.mxu2 %vm262_vm0, %v677_v14  ;;  %692 = vmatmul.msk.f32.gmra.mxu3 %vm262_vm0, %v686_v15 }
  0xcb   : > { %v292_v17 = vpop.f32.mrf.mxu0  ;;  %v360_v18 = vpop.f32.mrf.mxu1 }
  0xcc   : > { %v298_v20 = vmul.f32 %v292_v17, %v254_v16  ;;  %v310_v21 = vsel %vm256_vm1, %v292_v17, -inf  ;;  %v377_v22 = vsel %vm256_vm1, %v360_v18, -inf  ;;  %v366_v26 = vmul.f32 %v360_v18, %v254_v16 }
  0xcd   : > { %v312_v25 = vsel %vm300_vm2, %v310_v21, -inf  ;;  %v379_v30 = vsel %vm300_vm2, %v377_v22, -inf }
  0xce   : > { %v301_v29 = vsel %vm300_vm2, %v298_v20, 0.0  ;;  %v368_v41 = vsel %vm300_vm2, %v366_v26, 0.0 }
  0xd2   : > { %v427_v23 = vpop.f32.mrf.mxu2  ;;  %v494_v24 = vpop.f32.mrf.mxu3 }
  0xd3   : > { %v295_v27 = vpop.f32.mrf.mxu0  ;;  %v363_v28 = vpop.f32.mrf.mxu1  ;;  %v433_v33 = vmul.f32 %v427_v23, %v254_v16  ;;  %v444_v34 = vsel %vm256_vm1, %v427_v23, -inf  ;;  %v500_v37 = vmul.f32 %v494_v24, %v254_v16  ;;  %v511_v50 = vsel %vm256_vm1, %v494_v24, -inf }
  0xd4   : > { %v299_v31 = vmul.f32 %v295_v27, %v255_v19  ;;  %v311_v32 = vsel %vm257_vm3, %v295_v27, -inf  ;;  %v367_v36 = vmul.f32 %v363_v28, %v255_v19  ;;  %v378_v40 = vsel %vm257_vm3, %v363_v28, -inf }
  0xd5   : > { %v313_v35 = vsel %vm300_vm2, %v311_v32, -inf  ;;  %v380_v44 = vsel %vm300_vm2, %v378_v40, -inf  ;;  %v435_v48 = vsel %vm300_vm2, %v433_v33, 0.0  ;;  %v446_v49 = vsel %vm300_vm2, %v444_v34, -inf }
  0xd6   : > { %v302_v38 = vsel %vm300_vm2, %v299_v31, 0.0  ;;  %v314_v39 = vmax.f32 %v312_v25, %v313_v35  ;;  %v369_v43 = vsel %vm300_vm2, %v367_v36, 0.0  ;;  %v381_v47 = vmax.f32 %v379_v30, %v380_v44 }
  0xd7   : > { %v303_v42 = vadd.f32 %v302_v38, %v301_v29  ;;  %v370_v46 = vadd.f32 %v369_v43, %v368_v41  ;;  %v502_v52 = vsel %vm300_vm2, %v500_v37, 0.0  ;;  %v513_v23 = vsel %vm300_vm2, %v511_v50, -inf }
  0xd8   : > { %v315_v45 = vrot.slane %v314_v39, 4  ;;  %v382_v55 = vrot.slane %v381_v47, 4 }
  0xd9   : > { %v304_v51 = vrot.slane %v303_v42, 4  ;;  %v371_v54 = vrot.slane %v370_v46, 4 }
  0xda   : > { %v316_v53 = vmax.f32 %v314_v39, %v315_v45  ;;  %v430_v56 = vpop.f32.mrf.mxu2  ;;  %v497_v57 = vpop.f32.mrf.mxu3  ;;  %v383_v0 = vmax.f32 %v381_v47, %v382_v55 }
  0xdb   : > { %v305_v58 = vadd.f32 %v304_v51, %v303_v42  ;;  %v434_v59 = vmul.f32 %v430_v56, %v255_v19  ;;  %v445_v60 = vsel %vm257_vm3, %v430_v56, -inf  ;;  %v501_v61 = vmul.f32 %v497_v57, %v255_v19 }
  0xdc   : > { %v317_v62 = vrot.slane %v316_v53, 2  ;;  %v372_v63 = vadd.f32 %v371_v54, %v370_v46  ;;  %v447_v1 = vsel %vm300_vm2, %v445_v60, -inf  ;;  %v384_v8 = vrot.slane %v383_v0, 2 }
  0xdd   : > { %v306_v2 = vrot.slane %v305_v58, 2  ;;  %v436_v3 = vsel %vm300_vm2, %v434_v59, 0.0  ;;  %v448_v4 = vmax.f32 %v446_v49, %v447_v1  ;;  %v503_v5 = vsel %vm300_vm2, %v501_v61, 0.0 }
  0xde   : > { %v318_v6 = vmax.f32 %v316_v53, %v317_v62  ;;  %v373_v7 = vrot.slane %v372_v63, 2  ;;  %v437_v9 = vadd.f32 %v436_v3, %v435_v48  ;;  %v504_v12 = vadd.f32 %v503_v5, %v502_v52 }
  0xdf   : > { %v307_v10 = vadd.f32 %v306_v2, %v305_v58  ;;  %v449_v11 = vrot.slane %v448_v4, 4  ;;  %v512_v13 = vsel %vm257_vm3, %v497_v57, -inf  ;;  %v385_v16 = vmax.f32 %v383_v0, %v384_v8 }
  0xe0   : > { %v319_v14 = vrot.slane %v318_v6, 1  ;;  %v374_v15 = vadd.f32 %v373_v7, %v372_v63  ;;  %v438_v17 = vrot.slane %v437_v9, 4  ;;  %v505_v21 = vrot.slane %v504_v12, 4 }
  0xe1   : > { %v308_v18 = vrot.slane %v307_v10, 1  ;;  %v450_v20 = vmax.f32 %v448_v4, %v449_v11  ;;  %v514_v22 = vsel %vm300_vm2, %v512_v13, -inf  ;;  %v386_v25 = vrot.slane %v385_v16, 1 }
  0xe2   : > { %v375_v24 = vrot.slane %v374_v15, 1  ;;  %v439_v26 = vadd.f32 %v438_v17, %v437_v9  ;;  %v506_v29 = vadd.f32 %v505_v21, %v504_v12  ;;  %v515_v19 = vmax.f32 %v513_v23, %v514_v22 }
  0xe3   : > { %v309_v27 = vadd.f32 %v308_v18, %v307_v10  ;;  %v451_v28 = vrot.slane %v450_v20, 2  ;;  %v320_v30 = vmax.f32 %v318_v6, %v319_v14  ;;  %v387_v37 = vmax.f32 %v385_v16, %v386_v25 }
  0xe4   : > { %v376_v31 = vadd.f32 %v375_v24, %v374_v15  ;;  %v440_v32 = vrot.slane %v439_v26, 2  ;;  %v507_v35 = vrot.slane %v506_v29, 2  ;;  %v516_v36 = vrot.slane %v515_v19, 4 }
  0xe5   : > { %v321_v33 = vmul.f32 0.0625, %v309_v27  ;;  %v452_v34 = vmax.f32 %v450_v20, %v451_v28 }
  0xe6   : > { %v388_v38 = vmul.f32 0.0625, %v376_v31  ;;  %v441_v39 = vadd.f32 %v440_v32, %v439_v26  ;;  %v508_v41 = vadd.f32 %v507_v35, %v506_v29  ;;  %v517_v42 = vmax.f32 %v515_v19, %v516_v36 }
  0xe7   : > { %v322_v40 = vsub.f32 %v320_v30, %v321_v33  ;;  %v453_v45 = vrot.slane %v452_v34, 1 }
  0xe8   : > { %v389_v43 = vsub.f32 %v387_v37, %v388_v38  ;;  %v442_v44 = vrot.slane %v441_v39, 1  ;;  %v509_v46 = vrot.slane %v508_v41, 1  ;;  %v518_v47 = vrot.slane %v517_v42, 2 }
  0xe9   : > { %324 = vst.msk [vmem:[%s250_s6] sm:$0x1] %vm323_vm4, %v322_v40  ;;  %v454_v51 = vmax.f32 %v452_v34, %v453_v45 }
  0xea   : > { %675 = vst.msk [vmem:[%s250_s6 + $0x1] sm:$0x1] %vm323_vm4, %v389_v43  ;;  %v443_v48 = vadd.f32 %v442_v44, %v441_v39  ;;  %v510_v49 = vadd.f32 %v509_v46, %v508_v41  ;;  %v519_v50 = vmax.f32 %v517_v42, %v518_v47 }
  0xec   : > { %v455_v52 = vmul.f32 0.0625, %v443_v48  ;;  %v520_v53 = vrot.slane %v519_v50, 1  ;;  %v522_v54 = vmul.f32 0.0625, %v510_v49 }
  0xee   : > { %v456_v55 = vsub.f32 %v454_v51, %v455_v52  ;;  %v521_v56 = vmax.f32 %v519_v50, %v520_v53 }
  0xf0   : > { %684 = vst.msk [vmem:[%s250_s6 + $0x2] sm:$0x1] %vm323_vm4, %v456_v55  ;;  %v523_v57 = vsub.f32 %v521_v56, %v522_v54 }
  0xf2   : > { %693 = vst.msk [vmem:[%s250_s6 + $0x3] sm:$0x1] %vm323_vm4, %v523_v57 }
  0xf3   : > { %885 = shalt.err (!%p882_p11)
}
  0xf4   : > { %s937_s17 = smov 16   ;;  %s938_s27 = smov 1  }
  0xf5   : > { %710 = dma.vmem_to_hbm [thread:$0]  (%p1029_p7), %s539_s16, 64, %s541_s24, %s527_s11, %s937_s17, %s937_s17, %s938_s27  }
  0xf6 PF: > { %s555_s22 = sand.u32 1, %s920_s12   ;;  %p1206_p12 = scmp.ge.s32.totalorder %s932_s15, 2 }
  0xf7   : > { %s556_s23 = scalar_lea.sflag [#allocation4], %s555_s22 }
  0xf8   : > { %p724_p13 = pnand %p1206_p12, %p994_p6 }
  0xfa   : > { %p725_p0 = pneg %p724_p13 }
  0xfc   : > { %915 = dma.done.wait (%p725_p0), %s556_s23, 64  }
  0xfd   : > { %917 = vsyncadd (%p725_p0), %s556_s23, 4294967232  ;;  %p19_p3 = scmp.ge.s32.totalorder %s1012_s26, 4   ;;  %s1207_s12 = smov %s924_s13 }
  0xfe   : > { %s1208_s13 = smov %s928_s14  ;;  %s1209_s14 = smov %s1025_s4 }
  0xff   : > { %s1210_s15 = smov %s1012_s26  ;;  %21 = sbr.rel (!%p19_p3) target bundleno = 9 (0x9), region = 103 }
 0x104   :  { %562 = vsyncpa [#allocation3], 1 }
 0x105   :  { %564 = vsyncpa [#allocation3 + $0x1], 1 }
 0x106   :  { %565 = vsyncpa [#allocation6], 1 }
 0x107   :  { %567 = vsyncpa [#allocation6 + $0x1], 1 }
 0x108   :  { %568 = vsyncpa [#allocation4], 1 }
 0x109   :  { %570 = vsyncpa [#allocation4 + $0x1], 1 }

</bundles_post_ra>
